<compile_context>
chip_gen: v7x
topology: tpu7x:2x2x1
jax: 0.10.0
libtpu: 0.0.40
codegen_flags: <defaults>
</compile_context>

<pallas_src>
import functools
import math

import jax
import jax.numpy as jnp
from jax.experimental import pallas as pl
from jax.experimental.pallas import tpu as pltpu

LN_EPS = 1e-5  # PyTorch nn.LayerNorm default
_HIGHEST = jax.lax.Precision.HIGHEST  # only used by the f32 reference Linear

_TARGET_BLOCK_BYTES = 2 * 1024 * 1024   # ~2 MiB input block per grid step
_MIN_BLOCK_BYTES = 256 * 1024           # don't shrink tiles below ~256 KiB
_VMEM_BUDGET = 28 * 1024 * 1024         # per-step working-set cap (v7x: 64 MiB)


def _cdiv(a, b):
    return -(-a // b)


def _round8_up(n):
    return max(8, _cdiv(int(n), 8) * 8)


# ----------------------------- kernels -------------------------------------


def _norm_core(x, avg_ref, use_matmul):
    """(x - mean) * rsqrt(var + eps) per D-segment of each folded row (f32)."""
    x = x.astype(jnp.float32)
    if use_matmul:
        # avg is block-diagonal with 1/D entries: x @ avg == per-segment mean,
        # already broadcast across the segment.  DEFAULT precision => single
        # bf16 MXU pass with f32 accumulation (perf review item 1).
        avg = avg_ref[...]
        mean = jnp.dot(x, avg, preferred_element_type=jnp.float32)
        centered = x - mean
        # Centered form kept on purpose (E[x^2]-mean^2 risks cancellation).
        var = jnp.dot(centered * centered, avg,
                      preferred_element_type=jnp.float32)
    else:
        # Un-folded path (D already a multiple of 128, or too awkward to fold):
        # plain lane reduction over the last axis.
        mean = jnp.mean(x, axis=-1, keepdims=True)
        centered = x - mean
        var = jnp.mean(centered * centered, axis=-1, keepdims=True)
    # Biased variance + eps inside rsqrt == PyTorch nn.LayerNorm; rsqrt -> EUP.
    return centered * jax.lax.rsqrt(var + LN_EPS)


def _ln_kernel(x_ref, g_ref, b_ref, a_ref, o_ref, *, use_matmul):
    y = _norm_core(x_ref[...], a_ref, use_matmul) * g_ref[...] + b_ref[...]
    o_ref[...] = y.astype(o_ref.dtype)


def _ln_proj_kernel(x_ref, a_ref, w_ref, wb_ref, o_ref, *, use_matmul):
    # gamma/beta are pre-folded into w_ref / wb_ref at trace time.
    y = _norm_core(x_ref[...], a_ref, use_matmul)
    out = jnp.dot(y, w_ref[...], preferred_element_type=jnp.float32) + wb_ref[...]
    o_ref[...] = out.astype(o_ref.dtype)


# ----------------------------- wrapper helpers ------------------------------


def _fold_factor(d):
    """Rows folded per kernel row so the lane dim is a multiple of 128."""
    if d % 128 == 0 or d >= 128:
        return 1
    g = (d * 128 // math.gcd(d, 128)) // d  # lcm(d, 128) / d
    # Keep the folded width modest: the (L, L) averaging matmul costs O(L)
    # FLOP/byte, so very large L would flip the kernel to MXU-bound.
    if g * d > 384:
        return 1
    return g


def _avg_matrix(g, d):
    """(G*D, G*D) block-diagonal segment-averaging matrix, bf16 resident."""
    l = g * d
    seg = jnp.arange(l, dtype=jnp.int32) // d
    return jnp.where(seg[:, None] == seg[None, :], 1.0 / d, 0.0).astype(
        jnp.bfloat16)


def _pick_row_tile(folded_rows, in_row_bytes, vmem_per_row, row_tile):
    """Bytes-based tile sizing (review items 2-4)."""
    cap = max(8, (_VMEM_BUDGET // max(vmem_per_row, 1)) // 8 * 8)
    if row_tile is not None:
        return min(_round8_up(min(int(row_tile), folded_rows)), cap)
    target = min(cap, _round8_up(_TARGET_BLOCK_BYTES // max(in_row_bytes, 1)))
    if folded_rows <= target:
        return _round8_up(folded_rows)
    steps = _cdiv(folded_rows, target)
    # Prefer >= 4 grid steps (near-full DMA/compute overlap through the
    # software pipeline) and an even step count (v7x megacore: both
    # TensorCores get equal tiles), while keeping tiles large enough to
    # amortize the ~0.35us/step grid overhead.
    min_tile = min(target, _round8_up(_MIN_BLOCK_BYTES // max(in_row_bytes, 1)))
    while steps < 4 and _cdiv(folded_rows, steps * 2) >= min_tile:
        steps *= 2
    if steps % 2 and _cdiv(folded_rows, steps + 1) >= min_tile:
        steps += 1
    return min(_round8_up(_cdiv(folded_rows, steps)), cap)


# ----------------------------- main wrapper ---------------------------------


def _layernorm_impl(x, gamma, beta, w, wb, out_dtype, row_tile):
    orig_shape = x.shape
    d = orig_shape[-1]
    rows = math.prod(orig_shape[:-1]) if len(orig_shape) > 1 else 1
    in_dtype = jnp.dtype(x.dtype)
    out_dtype = jnp.dtype(in_dtype if out_dtype is None else out_dtype)

    g = _fold_factor(d)
    l_in = g * d
    use_matmul = g > 1

    fuse = w is not None
    if fuse:
        e = w.shape[-1]
        l_out = g * e
        # Fold gamma/beta into the resident weight/bias (review item 6):
        #   ((x-m)/s * gamma + beta) @ W + b
        # = ((x-m)/s) @ (diag(gamma) W) + (beta @ W + b)
        gamma_f = gamma.astype(jnp.float32).reshape(-1)
        beta_f = beta.astype(jnp.float32).reshape(-1)
        w32 = w.astype(jnp.float32)
        w_eff = gamma_f[:, None] * w32
        b_eff = beta_f @ w32 + wb.astype(jnp.float32).reshape(-1)
        # Block-diagonal folded weight; bf16 resident (DEFAULT MXU precision
        # truncates to bf16 anyway, so this only halves VMEM/HBM footprint).
        w_f = jnp.kron(jnp.eye(g, dtype=jnp.float32), w_eff).astype(jnp.bfloat16)
        wb_t = jnp.tile(b_eff, g).reshape(1, l_out)  # f32: VPU add, keep exact
    else:
        e = d
        l_out = l_in
        gamma_t = jnp.tile(gamma.astype(jnp.float32).reshape(-1), g).reshape(1, l_in)
        beta_t = jnp.tile(beta.astype(jnp.float32).reshape(-1), g).reshape(1, l_in)

    avg = _avg_matrix(g, d) if use_matmul else jnp.zeros((1, 1), jnp.bfloat16)

    in_row_bytes = l_in * in_dtype.itemsize
    out_row_bytes = l_out * out_dtype.itemsize
    # Conservative per-folded-row VMEM: double-buffered in/out blocks plus the
    # f32 temporaries the kernel materializes (x_f32, centered, y, out_f32).
    vmem_per_row = 2 * (in_row_bytes + out_row_bytes) + 4 * (2 * l_in + 2 * l_out)

    folded_rows = _cdiv(rows, g)
    row_tile = _pick_row_tile(folded_rows, in_row_bytes, vmem_per_row, row_tile)
    grid_n = _cdiv(folded_rows, row_tile)
    padded_folded = grid_n * row_tile
    padded_rows = padded_folded * g

    # Always lane-dense (review item 7): pad raw rows up to grid_n*row_tile*g.
    # Padded zero rows normalize to finite values and are sliced off below.
    x2 = x.reshape(rows, d)
    if padded_rows != rows:
        x2 = jnp.pad(x2, ((0, padded_rows - rows), (0, 0)))
    x2 = x2.reshape(padded_folded, l_in)   # row-major fold: free (metadata only)

    # Accurate VMEM need (review item 9): blocks + residents + headroom.
    resident_bytes = 2 * avg.size * avg.dtype.itemsize
    if fuse:
        resident_bytes += 2 * (w_f.size * w_f.dtype.itemsize + wb_t.size * 4)
    else:
        resident_bytes += 2 * (gamma_t.size + beta_t.size) * 4
    need = row_tile * vmem_per_row + resident_bytes + (2 << 20)
    vmem_limit = int(min(40 << 20, max(16 << 20, need)))

    def const_spec(shape):
        # NOTE: residents keep the default 2-deep buffering; pl.Buffered(1)
        # would shave a little VMEM but is not needed at these sizes.
        return pl.BlockSpec(shape, lambda i: (0, 0))

    x_spec = pl.BlockSpec((row_tile, l_in), lambda i: (i, 0))
    out_spec = pl.BlockSpec((row_tile, l_out), lambda i: (i, 0))

    if fuse:
        kernel = functools.partial(_ln_proj_kernel, use_matmul=use_matmul)
        in_specs = [x_spec, const_spec(avg.shape), const_spec(w_f.shape),
                    const_spec(wb_t.shape)]
        operands = [x2, avg, w_f, wb_t]
    else:
        kernel = functools.partial(_ln_kernel, use_matmul=use_matmul)
        in_specs = [x_spec, const_spec((1, l_in)), const_spec((1, l_in)),
                    const_spec(avg.shape)]
        operands = [x2, gamma_t, beta_t, avg]

    out = pl.pallas_call(
        kernel,
        out_shape=jax.ShapeDtypeStruct((padded_folded, l_out), out_dtype),
        grid=(grid_n,),
        in_specs=in_specs,
        out_specs=out_spec,
        compiler_params=pltpu.CompilerParams(
            dimension_semantics=("parallel",),
            vmem_limit_bytes=vmem_limit,
        ),
    )(*operands)

    out = out.reshape(padded_rows, e)
    if padded_rows != rows:
        out = out[:rows]
    return out.reshape(*orig_shape[:-1], e)


@functools.partial(jax.jit, static_argnames=("out_dtype", "row_tile"))
def layernorm_pallas(x, gamma, beta, *, out_dtype=None, row_tile=None):
    """LayerNorm over the last axis of x (any leading dims), via Pallas."""
    return _layernorm_impl(x, gamma, beta, None, None, out_dtype, row_tile)


@functools.partial(jax.jit, static_argnames=("out_dtype", "row_tile"))
def layernorm_linear_pallas(x, gamma, beta, weight, bias, *, out_dtype=None,
                            row_tile=None):
    """Fused LayerNorm + linear projection (single pass over activations)."""
    return _layernorm_impl(x, gamma, beta, weight, bias, out_dtype, row_tile)


# ----------------------------- module ---------------------------------------


class Linear:
    """Minimal deterministic linear layer (a common `fn` for PreNorm)."""

    def __init__(self, in_dim, out_dim, key, dtype=jnp.float32):
        kw, kb = jax.random.split(key)
        lim = 1.0 / math.sqrt(in_dim)
        self.weight = jax.random.uniform(kw, (in_dim, out_dim), dtype, -lim, lim)
        self.bias = jax.random.uniform(kb, (out_dim,), dtype, -lim, lim)

    def __call__(self, h):
        y = jnp.dot(h, self.weight, precision=_HIGHEST)  # f32 reference path
        return y + self.bias


class CatPreNorm:
    """JAX mirror of Cat_PreNorm: forward(x) = fn(LayerNorm(emb_dim)(x))."""

    def __init__(self, emb_dim, dim, fn):
        # nn.LayerNorm(emb_dim) default init: weight = 1, bias = 0.
        self.gamma = jnp.ones((emb_dim,), jnp.float32)
        self.beta = jnp.zeros((emb_dim,), jnp.float32)
        self.fn = fn

    def __call__(self, x, **kwargs):
        if isinstance(self.fn, Linear) and not kwargs:
            # Fused LN + projection in one pallas_call (no HBM round trip).
            # Pass out_dtype=jnp.bfloat16 here for mixed-precision models.
            return layernorm_linear_pallas(x, self.gamma, self.beta,
                                           self.fn.weight, self.fn.bias)
        return self.fn(layernorm_pallas(x, self.gamma, self.beta), **kwargs)


# ----------------------------- demo / check ----------------------------------


def _ln_reference(x, gamma, beta):
    xf = x.astype(jnp.float32)
    mean = jnp.mean(xf, axis=-1, keepdims=True)
    var = jnp.mean((xf - mean) ** 2, axis=-1, keepdims=True)
    return (xf - mean) * jax.lax.rsqrt(var + LN_EPS) * gamma + beta


if __name__ == "__main__":
    key = jax.random.PRNGKey(0)
    kx, kfn, kx2 = jax.random.split(key, 3)

    # --- fused path: fn is a Linear projection (lane-dense folded layout) ---
    batch, seq, emb_dim, dim = 2, 64, 32, 32
    x = jax.random.normal(kx, (batch, seq, emb_dim), dtype=jnp.float32)
    fn = Linear(emb_dim, dim, kfn)
    module = CatPreNorm(emb_dim, dim, fn)
    out = jax.block_until_ready(module(x))
    ref = fn(_ln_reference(x, module.gamma, module.beta))
    assert out.shape == (batch, seq, dim)
    # DEFAULT-precision MXU (bf16 operands, f32 accumulate) per the perf
    # review: validate vs the f32 reference at mixed-precision tolerance.
    assert jnp.allclose(out, ref, atol=2e-2, rtol=2e-2), "fused LN+Linear mismatch"

    # --- generic path: arbitrary fn + ragged row count (fold-padding path) ---
    x2 = jax.random.normal(kx2, (3, 13, emb_dim), dtype=jnp.float32)
    fn2 = lambda h: jnp.tanh(h)
    module2 = CatPreNorm(emb_dim, dim, fn2)
    out2 = jax.block_until_ready(module2(x2))
    ref2 = fn2(_ln_reference(x2, module2.gamma, module2.beta))
    assert out2.shape == x2.shape
    assert jnp.allclose(out2, ref2, atol=1e-2, rtol=1e-2), "generic LN mismatch"

    print("KERNEL_OK")
</pallas_src>

<mosaic_0001>
module attributes {stable_mosaic.version = 11 : i64} {
  func.func @_ln_proj_kernel(%arg0: i32, %arg1: memref<32x128xf32, #tpu.memory_space<vmem>>, %arg2: memref<128x128xbf16, #tpu.memory_space<vmem>>, %arg3: memref<128x128xbf16, #tpu.memory_space<vmem>>, %arg4: memref<1x128xf32, #tpu.memory_space<vmem>>, %arg5: memref<32x128xf32, #tpu.memory_space<vmem>>) attributes {dimension_semantics = [#tpu.dimension_semantics<parallel>], iteration_bounds = array<i64: 1>, scalar_prefetch = 0 : i64, scratch_operands = 0 : i64, tpu.core_type = #tpu.core_type<tc>, window_params = [{transform_indices = @transform_0, window_bounds = array<i64: 32, 128>}, {pipeline_mode = #tpu.pipeline_mode<synchronous>, transform_indices = @transform_1, window_bounds = array<i64: 128, 128>}, {pipeline_mode = #tpu.pipeline_mode<synchronous>, transform_indices = @transform_2, window_bounds = array<i64: 128, 128>}, {pipeline_mode = #tpu.pipeline_mode<synchronous>, transform_indices = @transform_3, window_bounds = array<i64: 1, 128>}, {transform_indices = @transform_4, window_bounds = array<i64: 32, 128>}]} {
    %c0 = arith.constant 0 : index
    %c0_0 = arith.constant 0 : index
    %0 = vector.load %arg1[%c0, %c0_0] : memref<32x128xf32, #tpu.memory_space<vmem>>, vector<32x128xf32>
    %c0_1 = arith.constant 0 : index
    %c0_2 = arith.constant 0 : index
    %1 = vector.load %arg2[%c0_1, %c0_2] : memref<128x128xbf16, #tpu.memory_space<vmem>>, vector<128x128xbf16>
    %cst = arith.constant dense<0.000000e+00> : vector<32x128xf32>
    %2 = tpu.matmul %0, %1, %cst {dimension_numbers = #tpu.dot_dimension_numbers<[1], [0], [0], [1], [0, 0, 1, 1], [], []>} : vector<32x128xf32>, vector<128x128xbf16>, vector<32x128xf32> -> vector<32x128xf32>
    %3 = arith.subf %0, %2 : vector<32x128xf32>
    %4 = arith.mulf %3, %3 : vector<32x128xf32>
    %cst_3 = arith.constant dense<0.000000e+00> : vector<32x128xf32>
    %5 = tpu.matmul %4, %1, %cst_3 {dimension_numbers = #tpu.dot_dimension_numbers<[1], [0], [0], [1], [0, 0, 1, 1], [], []>} : vector<32x128xf32>, vector<128x128xbf16>, vector<32x128xf32> -> vector<32x128xf32>
    %cst_4 = arith.constant 9.99999974E-6 : f32
    %6 = vector.broadcast %cst_4 : f32 to vector<32x128xf32>
    %7 = arith.addf %5, %6 : vector<32x128xf32>
    %8 = math.rsqrt %7 : vector<32x128xf32>
    %9 = arith.mulf %3, %8 : vector<32x128xf32>
    %c0_5 = arith.constant 0 : index
    %c0_6 = arith.constant 0 : index
    %10 = vector.load %arg3[%c0_5, %c0_6] : memref<128x128xbf16, #tpu.memory_space<vmem>>, vector<128x128xbf16>
    %cst_7 = arith.constant dense<0.000000e+00> : vector<32x128xf32>
    %11 = tpu.matmul %9, %10, %cst_7 {dimension_numbers = #tpu.dot_dimension_numbers<[1], [0], [0], [1], [0, 0, 1, 1], [], []>} : vector<32x128xf32>, vector<128x128xbf16>, vector<32x128xf32> -> vector<32x128xf32>
    %c0_8 = arith.constant 0 : index
    %c0_9 = arith.constant 0 : index
    %12 = vector.load %arg4[%c0_8, %c0_9] : memref<1x128xf32, #tpu.memory_space<vmem>>, vector<1x128xf32>
    %13 = vector.broadcast %12 : vector<1x128xf32> to vector<32x128xf32>
    %14 = arith.addf %11, %13 : vector<32x128xf32>
    %c0_10 = arith.constant 0 : index
    %c0_11 = arith.constant 0 : index
    %15 = vector.load %arg5[%c0_10, %c0_11] : memref<32x128xf32, #tpu.memory_space<vmem>>, vector<32x128xf32>
    tpu.vector_store %arg5[%c0_10, %c0_11], %14 {strides = array<i32>} : memref<32x128xf32, #tpu.memory_space<vmem>>, vector<32x128xf32>,
    return
  }
  func.func @transform_0(%arg0: i32) -> (i32, i32) {
    %c0_i32 = arith.constant 0 : i32
    %c0_i32_0 = arith.constant 0 : i32
    return %arg0, %c0_i32 : i32, i32
  }
  func.func @transform_1(%arg0: i32) -> (i32, i32) {
    %c0_i32 = arith.constant 0 : i32
    %c0_i32_0 = arith.constant 0 : i32
    %c0_i32_1 = arith.constant 0 : i32
    return %c0_i32, %c0_i32_0 : i32, i32
  }
  func.func @transform_2(%arg0: i32) -> (i32, i32) {
    %c0_i32 = arith.constant 0 : i32
    %c0_i32_0 = arith.constant 0 : i32
    %c0_i32_1 = arith.constant 0 : i32
    return %c0_i32, %c0_i32_0 : i32, i32
  }
  func.func @transform_3(%arg0: i32) -> (i32, i32) {
    %c0_i32 = arith.constant 0 : i32
    %c0_i32_0 = arith.constant 0 : i32
    %c0_i32_1 = arith.constant 0 : i32
    return %c0_i32, %c0_i32_0 : i32, i32
  }
  func.func @transform_4(%arg0: i32) -> (i32, i32) {
    %c0_i32 = arith.constant 0 : i32
    %c0_i32_0 = arith.constant 0 : i32
    return %arg0, %c0_i32 : i32, i32
  }
}

</mosaic_0001>

<bundles_post_ra>
// kernel: tile.8
= control target key start
LH: loop header
LB: loop body
LE: loop exit
PB: predicated region body
PF: predicated region fallthrough
CT: control target
= control target key end

     0   :  { %s22_s0 = inlined_call_operand.vmem [shape: f32[32], index: 0, kind: input, shape index: {}]   ;;  %s23_s1 = inlined_call_operand.vmem [shape: f32[4,32], index: 1, kind: output, shape index: {}]  }
   0x1   :  { %v4_v0 = vld [vmem:[%s22_s0] ss:$0 sm:$0xff] }
   0x2   :  { %5 = vst [vmem:[%s23_s1] sm:$0xf] %v4_v0 }

// kernel: tile.9
= control target key start
LH: loop header
LB: loop body
LE: loop exit
PB: predicated region body
PF: predicated region fallthrough
CT: control target
= control target key end

     0   :  { %vm7_vm0 = vcmask 261120   ;;  %s37_s8 = smov 32   ;;  %s38_s9 = smov 64   ;;  %vm13_vm1 = vcmask 1048320   ;;  %vm19_vm2 = vcmask 785920   ;;  %vm25_vm3 = vcmask 523520   ;;  %s55_s0 = inlined_call_operand.vmem [shape: f32[4,32], index: 0, kind: input, shape index: {}]   ;;  %s56_s1 = inlined_call_operand.vmem [shape: f32[1,128], index: 1, kind: output, shape index: {}]  }
   0x1   :  { %v4_v0 = vld [vmem:[%s55_s0] sm:$0xf]  ;;  %s36_s0 = smov 96  }
   0x2   :  { %5 = vst [vmem:[#allocation1] sm:$0xf] %v4_v0 }
   0x9   :  { %v10_v1 = vld [vmem:[#allocation1 + $0x3] sm:$0x1]   ;;  %v22_v2 = vld [vmem:[#allocation1 + $0x1] sm:$0x1]   ;;  %v6_v3 = vld [vmem:[#allocation1] sm:$0x1]  }
   0xa   :  { %11 = vrot.lane.b32.xlu0 %v10_v1, %s36_s0  ;;  %23 = vrot.lane.b32.xlu1 %v22_v2, %s37_s8  ;;  %v16_v4 = vld [vmem:[#allocation1 + $0x2] sm:$0x1]   ;;  %8 = vst.msk [vmem:[#allocation0] sm:$0x1] %vm7_vm0, %v6_v3  }
   0xe   :  { %17 = vrot.lane.b32.xlu0 %v16_v4, %s38_s9 }
  0x7c   :  { %v12_v5 = vpop.permute.xlu0 %11   ;;  %v24_v6 = vpop.permute.xlu1 %23  }
  0x7d   :  { %14 = vst.msk [vmem:[#allocation0] sm:$0x1] %vm13_vm1, %v12_v5  }
  0x80   :  { %v18_v7 = vpop.permute.xlu0 %17  }
  0x81   :  { %20 = vst.msk [vmem:[#allocation0] sm:$0x1] %vm19_vm2, %v18_v7  }
  0x82   :  { %26 = vst.msk [vmem:[#allocation0] sm:$0x1] %vm25_vm3, %v24_v6  }
  0x89   :  { %v30_v8 = vld [vmem:[#allocation0] sm:$0x1] }
  0x8a   :  { %32 = vst [vmem:[%s56_s1] sm:$0x1] %v30_v8 }

// kernel: layernorm_linear_pallas.1
= control target key start
LH: loop header
LB: loop body
LE: loop exit
PB: predicated region body
PF: predicated region fallthrough
CT: control target
= control target key end

     0   :  { %s599_s1 = inlined_call_operand.vmem [shape: bf16[128,128], index: 1, kind: input, shape index: {}]   ;;  %s600_s0 = inlined_call_operand.vmem [shape: f32[32,128], index: 0, kind: input, shape index: {}]   ;;  %s601_s2 = inlined_call_operand.vmem [shape: bf16[128,128], index: 2, kind: input, shape index: {}]   ;;  %s602_s3 = inlined_call_operand.vmem [shape: f32[1,128], index: 3, kind: input, shape index: {}]   ;;  %s603_s4 = inlined_call_operand.vmem [shape: f32[32,128], index: 4, kind: output, shape index: {}]  }
   0x1   :  { %v475_v0 = vld [vmem:[%s599_s1] sm:$0xff]   ;;  %v476_v1 = vld [vmem:[%s599_s1 + $0x8] sm:$0xff]   ;;  %v477_v2 = vld [vmem:[%s599_s1 + $0x10] sm:$0xff]  }
   0x2   :  { %393 = vmatprep.subr.bf16.mxu0 %v475_v0  ;;  %415 = vmatprep.subr.bf16.mxu1 %v475_v0  ;;  %v478_v3 = vld [vmem:[%s599_s1 + $0x18] sm:$0xff]   ;;  %v18_v4 = vld [vmem:[%s600_s0] sm:$0xff]  ;;  %v480_v6 = vld [vmem:[%s599_s1 + $0x28] sm:$0xff]  }
   0x3   :  { %394 = vmatpush3.bf16.msra.mxu0 %v475_v0  ;;  %416 = vmatpush3.bf16.msra.mxu1 %v475_v0  ;;  %v479_v5 = vld [vmem:[%s599_s1 + $0x20] sm:$0xff]   ;;  %v481_v7 = vld [vmem:[%s599_s1 + $0x30] sm:$0xff]   ;;  %v482_v8 = vld [vmem:[%s599_s1 + $0x38] sm:$0xff]  }
   0x4   :  { %395 = vmatprep.subr.bf16.mxu0 %v476_v1  ;;  %417 = vmatprep.subr.bf16.mxu1 %v476_v1  ;;  %v19_v9 = vld [vmem:[%s600_s0 + $0x8] sm:$0xff]  ;;  %v20_v10 = vld [vmem:[%s600_s0 + $0x10] sm:$0xff]  ;;  %v21_v11 = vld [vmem:[%s600_s0 + $0x18] sm:$0xff] }
   0x5   :  { %409 = vmatprep.mubr.f32.mxu0 %v18_v4  ;;  %v483_v12 = vld [vmem:[%s601_s2] sm:$0xff]   ;;  %v484_v13 = vld [vmem:[%s601_s2 + $0x8] sm:$0xff]   ;;  %v485_v14 = vld [vmem:[%s601_s2 + $0x10] sm:$0xff]  }
   0x6   :  { %v486_v15 = vld [vmem:[%s601_s2 + $0x18] sm:$0xff]   ;;  %v487_v28 = vld [vmem:[%s601_s2 + $0x20] sm:$0xff]   ;;  %v488_v29 = vld [vmem:[%s601_s2 + $0x28] sm:$0xff]  }
   0x7   :  { %396 = vmatpush3.bf16.msra.mxu0 %v476_v1  ;;  %418 = vmatpush3.bf16.msra.mxu1 %v476_v1  ;;  %v489_v30 = vld [vmem:[%s601_s2 + $0x30] sm:$0xff]   ;;  %v490_v31 = vld [vmem:[%s601_s2 + $0x38] sm:$0xff]   ;;  %v348_v48 = vld [vmem:[%s602_s3] ss:$0 sm:$0xff] }
   0x8   :  { %397 = vmatprep.subr.bf16.mxu0 %v477_v2  ;;  %419 = vmatprep.subr.bf16.mxu1 %v477_v2 }
   0xb   :  { %398 = vmatpush3.bf16.msra.mxu0 %v477_v2  ;;  %420 = vmatpush3.bf16.msra.mxu1 %v477_v2 }
   0xc   :  { %399 = vmatprep.subr.bf16.mxu0 %v478_v3  ;;  %421 = vmatprep.subr.bf16.mxu1 %v478_v3 }
   0xf   :  { %400 = vmatpush3.bf16.msra.mxu0 %v478_v3  ;;  %422 = vmatpush3.bf16.msra.mxu1 %v478_v3 }
  0x10   :  { %401 = vmatprep.subr.bf16.mxu0 %v479_v5  ;;  %423 = vmatprep.subr.bf16.mxu1 %v479_v5 }
  0x13   :  { %402 = vmatpush3.bf16.msra.mxu0 %v479_v5  ;;  %424 = vmatpush3.bf16.msra.mxu1 %v479_v5 }
  0x14   :  { %403 = vmatprep.subr.bf16.mxu0 %v480_v6  ;;  %425 = vmatprep.subr.bf16.mxu1 %v480_v6 }
  0x17   :  { %404 = vmatpush3.bf16.msra.mxu0 %v480_v6  ;;  %426 = vmatpush3.bf16.msra.mxu1 %v480_v6 }
  0x18   :  { %405 = vmatprep.subr.bf16.mxu0 %v481_v7  ;;  %427 = vmatprep.subr.bf16.mxu1 %v481_v7 }
  0x1b   :  { %406 = vmatpush3.bf16.msra.mxu0 %v481_v7  ;;  %428 = vmatpush3.bf16.msra.mxu1 %v481_v7 }
  0x1c   :  { %407 = vmatprep.subr.bf16.mxu0 %v482_v8  ;;  %429 = vmatprep.subr.bf16.mxu1 %v482_v8 }
  0x1f   :  { %408 = vmatpush3.bf16.msra.mxu0 %v482_v8  ;;  %430 = vmatpush3.bf16.msra.mxu1 %v482_v8 }
  0x20   :  { %437 = vmatprep.subr.bf16.mxu0 %v483_v12  ;;  %459 = vmatprep.subr.bf16.mxu1 %v483_v12 }
  0x22   :  { %410 = vmatmul.mubr.f32.vlgmr.msra.gmra.mrb[0].mxu0 %v19_v9 }
  0x23   :  { %412 = vmatprep.mubr.f32.mxu0 %v20_v10  ;;  %438 = vmatpush3.bf16.msra.mxu0 %v483_v12 }
  0x24   :  { %439 = vmatprep.subr.bf16.mxu0 %v484_v13 }
  0x26   :  { %413 = vmatmul.mubr.f32.gmra.mrb[2].mxu0 %v21_v11 }
  0x27   :  { %440 = vmatpush3.bf16.msra.mxu0 %v484_v13 }
  0x28   :  { %441 = vmatprep.subr.bf16.mxu0 %v485_v14 }
  0x2b   :  { %442 = vmatpush3.bf16.msra.mxu0 %v485_v14 }
  0x2c   :  { %443 = vmatprep.subr.bf16.mxu0 %v486_v15 }
  0x2f   :  { %444 = vmatpush3.bf16.msra.mxu0 %v486_v15 }
  0x30   :  { %445 = vmatprep.subr.bf16.mxu0 %v487_v28 }
  0x33   :  { %446 = vmatpush3.bf16.msra.mxu0 %v487_v28 }
  0x34   :  { %447 = vmatprep.subr.bf16.mxu0 %v488_v29 }
  0x37   :  { %448 = vmatpush3.bf16.msra.mxu0 %v488_v29 }
  0x38   :  { %449 = vmatprep.subr.bf16.mxu0 %v489_v30 }
  0x3b   :  { %450 = vmatpush3.bf16.msra.mxu0 %v489_v30 }
  0x3c   :  { %451 = vmatprep.subr.bf16.mxu0 %v490_v31 }
  0x3f   :  { %452 = vmatpush3.bf16.msra.mxu0 %v490_v31 }
  0xf5   :  { %v411_v16 = vpop.f32.mrb[0].mxu0 }
  0xf6   :  { %v140_v17 = vsub.f32 %v19_v9, %v411_v16  ;;  %v120_v18 = vpop.f32.mrb[1].mxu0 }
  0xf7   :  { %v139_v19 = vsub.f32 %v18_v4, %v120_v18 }
  0xf8   :  { %v144_v22 = vmul.f32 %v140_v17, %v140_v17 }
  0xf9   :  { %v414_v20 = vpop.f32.mrb[2].mxu0  ;;  %v143_v21 = vmul.f32 %v139_v19, %v139_v19 }
  0xfa   :  { %v142_v23 = vsub.f32 %v21_v11, %v414_v20  ;;  %v130_v24 = vpop.f32.mrb[3].mxu0 }
  0xfb   :  { %v141_v25 = vsub.f32 %v20_v10, %v130_v24  ;;  %431 = vmatprep.mubr.f32.mxu1 %v143_v21 }
  0xfc   :  { %432 = vmatmul.mubr.f32.vlgmr.msra.gmra.mrb[0].mxu1 %v144_v22  ;;  %v146_v27 = vmul.f32 %v142_v23, %v142_v23 }
  0xfd   :  { %v145_v26 = vmul.f32 %v141_v25, %v141_v25  ;;  %467 = vmatpush3.bf16.msra.mxu1 %v483_v12 }
  0xfe   :  { %460 = vmatprep.subr.bf16.mxu1 %v484_v13 }
  0xff   :  { %434 = vmatprep.mubr.f32.mxu1 %v145_v26 }
 0x100   :  { %435 = vmatmul.mubr.f32.gmra.mrb[2].mxu1 %v146_v27 }
 0x101   :  { %468 = vmatpush3.bf16.msra.mxu1 %v484_v13 }
 0x102   :  { %461 = vmatprep.subr.bf16.mxu1 %v485_v14 }
 0x105   :  { %469 = vmatpush3.bf16.msra.mxu1 %v485_v14 }
 0x106   :  { %462 = vmatprep.subr.bf16.mxu1 %v486_v15 }
 0x109   :  { %470 = vmatpush3.bf16.msra.mxu1 %v486_v15 }
 0x10a   :  { %463 = vmatprep.subr.bf16.mxu1 %v487_v28 }
 0x10d   :  { %471 = vmatpush3.bf16.msra.mxu1 %v487_v28 }
 0x10e   :  { %464 = vmatprep.subr.bf16.mxu1 %v488_v29 }
 0x111   :  { %472 = vmatpush3.bf16.msra.mxu1 %v488_v29 }
 0x112   :  { %465 = vmatprep.subr.bf16.mxu1 %v489_v30 }
 0x115   :  { %473 = vmatpush3.bf16.msra.mxu1 %v489_v30 }
 0x116   :  { %466 = vmatprep.subr.bf16.mxu1 %v490_v31 }
 0x119   :  { %474 = vmatpush3.bf16.msra.mxu1 %v490_v31 }
 0x1cf   :  { %v433_v32 = vpop.f32.mrb[0].mxu1 }
 0x1d0   :  { %v187_v33 = vadd.f32 1e-05, %v433_v32  ;;  %v181_v34 = vpop.f32.mrb[1].mxu1 }
 0x1d1   :  { %v182_v35 = vadd.f32 1e-05, %v181_v34 }
 0x1d2   :  { %491 = vrsqrt.f32 %v187_v33 }
 0x1d3   :  { %493 = vrsqrt.f32 %v182_v35  ;;  %v436_v36 = vpop.f32.mrb[2].mxu1 }
 0x1d4   :  { %v197_v37 = vadd.f32 1e-05, %v436_v36  ;;  %v191_v38 = vpop.f32.mrb[3].mxu1 }
 0x1d5   :  { %v192_v39 = vadd.f32 1e-05, %v191_v38 }
 0x1d6   :  { %495 = vrsqrt.f32 %v197_v37 }
 0x1d7   :  { %497 = vrsqrt.f32 %v192_v39 }
 0x1dc   :  { %v492_v40 = vpop.eup %491 }
 0x1dd   :  { %v494_v41 = vpop.eup %493  ;;  %v205_v43 = vmul.f32 %v492_v40, %v140_v17 }
 0x1de   :  { %v204_v42 = vmul.f32 %v494_v41, %v139_v19 }
 0x1e0   :  { %v496_v44 = vpop.eup %495  ;;  %453 = vmatprep.mubr.f32.mxu0 %v204_v42 }
 0x1e1   :  { %v498_v45 = vpop.eup %497  ;;  %454 = vmatmul.mubr.f32.vlgmr.msra.gmra.mrb[4].mxu0 %v205_v43  ;;  %v207_v47 = vmul.f32 %v496_v44, %v142_v23 }
 0x1e2   :  { %v206_v46 = vmul.f32 %v498_v45, %v141_v25 }
 0x1e4   :  { %456 = vmatprep.mubr.f32.mxu1 %v206_v46 }
 0x1e5   :  { %457 = vmatmul.mubr.f32.vlgmr.msra.gmra.mrb[4].mxu1 %v207_v47 }
 0x2b4   :  { %v455_v49 = vpop.f32.mrb[4].mxu0 }
 0x2b5   :  { %v319_v50 = vadd.f32 %v455_v49, %v348_v48  ;;  %v313_v51 = vpop.f32.mrb[5].mxu0 }
 0x2b6   :  { %v314_v52 = vadd.f32 %v348_v48, %v313_v51 }
 0x2b7   :  { %333 = vst [vmem:[%s603_s4 + $0x8] sm:$0xff] %v319_v50 }
 0x2b8   :  { %332 = vst [vmem:[%s603_s4] sm:$0xff] %v314_v52  ;;  %v458_v53 = vpop.f32.mrb[4].mxu1 }
 0x2b9   :  { %v329_v54 = vadd.f32 %v458_v53, %v348_v48  ;;  %v323_v55 = vpop.f32.mrb[5].mxu1 }
 0x2ba   :  { %v324_v56 = vadd.f32 %v348_v48, %v323_v55 }
 0x2bb   :  { %335 = vst [vmem:[%s603_s4 + $0x18] sm:$0xff] %v329_v54 }
 0x2bc   :  { %334 = vst [vmem:[%s603_s4 + $0x10] sm:$0xff] %v324_v56 }

</bundles_post_ra>
